<compile_context>
chip_gen: v6e
topology: v6e:2x2x1
jax: 0.10.0
libtpu: 0.0.40
codegen_flags: <defaults>
</compile_context>

<pallas_src>
import jax
import jax.numpy as jnp
from jax import lax
from jax.experimental import pallas as pl
from jax.experimental.pallas import tpu as pltpu

SCALE = 1.153
DROP_P = 0.3
_INV_KEEP = 1.0 / (1.0 - DROP_P)
# bits < threshold  -> dropped   (P(drop) = threshold / 2^32 = DROP_P)
_DROP_THRESHOLD = int(DROP_P * (1 << 32))


def _attn_dropout_kernel(x1_ref, x2_ref, bits_ref, o_ref):
    x1 = x1_ref[...]                      # (TM, D)  native dtype
    x2 = x2_ref[...]                      # (N,  D)  native dtype

    # scores = (x1 @ x2^T) * scale, contracting D directly (no transpose).
    scores = lax.dot_general(
        x1, x2,
        dimension_numbers=(((1,), (1,)), ((), ())),
        preferred_element_type=jnp.float32,
    ) * SCALE                              # (TM, N) f32

    # softmax over last dim (numerically stable)
    m = jnp.max(scores, axis=-1, keepdims=True)
    e = jnp.exp(scores - m)
    denom = jnp.sum(e, axis=-1, keepdims=True)
    # fold softmax normalization and dropout rescale (1/(1-p)) into one factor
    inv = pl.reciprocal(denom, approx=True) * _INV_KEEP     # (TM, 1)

    # dropout: keep with prob (1-p) via integer threshold compare
    keep = bits_ref[...] >= jnp.uint32(_DROP_THRESHOLD)     # (TM, N) bool
    dropped = jnp.where(keep, e * inv, 0.0)                 # (TM, N) f32

    # output = dropped @ x2  (MXU consumes operands in x2's native dtype,
    # accumulates in f32)
    out = jnp.dot(dropped.astype(x2.dtype), x2,
                  preferred_element_type=jnp.float32)       # (TM, D)
    o_ref[...] = out.astype(o_ref.dtype)


def _pick_m_tile(M):
    for tm in (512, 256, 128):
        if M % tm == 0:
            return tm
    return M  # small / irregular M: take the whole M extent


def attn_dropout(x1, x2, key):
    """x1: (B, M, D), x2: (B, N, D) -> (B, M, D)"""
    B, M, D = x1.shape
    B2, N, D2 = x2.shape
    assert D == D2 and B2 == B

    TM = _pick_m_tile(M)
    m_tiles = M // TM

    # host-side random bits for dropout, one uint32 per (b, m, n)
    bits = jax.random.bits(key, (B, M, N), dtype=jnp.uint32)

    # VMEM budget estimate (double-buffered IO + f32 working set), clamped so
    # it stays under v7x's 64 MiB physical VMEM.
    itemsize = jnp.dtype(x1.dtype).itemsize
    est = (2 * (TM * D * itemsize + N * D * itemsize + TM * N * 4
                + TM * D * itemsize)
           + 4 * TM * N * 4)
    vmem_limit = int(min(max(2 * est, 32 * 1024 * 1024), 64 * 1024 * 1024))

    return pl.pallas_call(
        _attn_dropout_kernel,
        out_shape=jax.ShapeDtypeStruct((B, M, D), x1.dtype),
        grid=(B, m_tiles),
        in_specs=[
            pl.BlockSpec((None, TM, D), lambda b, mi: (b, mi, 0)),  # x1 tile
            pl.BlockSpec((None, N, D), lambda b, mi: (b, 0, 0)),    # x2 resident per batch
            pl.BlockSpec((None, TM, N), lambda b, mi: (b, mi, 0)),  # dropout bits tile
        ],
        out_specs=pl.BlockSpec((None, TM, D), lambda b, mi: (b, mi, 0)),
        compiler_params=pltpu.CompilerParams(
            dimension_semantics=("parallel", "parallel"),
            vmem_limit_bytes=vmem_limit,
        ),
    )(x1, x2, bits)


if __name__ == "__main__":
    key = jax.random.PRNGKey(0)
    k1, k2, k_drop = jax.random.split(key, 3)

    B, M, N, D = 2, 8, 8, 32
    x1 = jax.random.normal(k1, (B, M, D), dtype=jnp.float32)
    x2 = jax.random.normal(k2, (B, N, D), dtype=jnp.float32)

    out = attn_dropout(x1, x2, k_drop)
    jax.block_until_ready(out)

    assert out.shape == (B, M, D)
    assert out.dtype == jnp.float32
    assert bool(jnp.all(jnp.isfinite(out)))

    # sanity vs. pure-JAX reference using the SAME dropout mask
    bits = jax.random.bits(k_drop, (B, M, N), dtype=jnp.uint32)
    keep = bits >= jnp.uint32(_DROP_THRESHOLD)
    s = jnp.einsum("bmd,bnd->bmn", x1, x2) * SCALE
    p = jax.nn.softmax(s, axis=-1)
    p = jnp.where(keep, p * _INV_KEEP, 0.0)
    ref = jnp.einsum("bmn,bnd->bmd", p, x2)
    assert bool(jnp.max(jnp.abs(ref - out)) < 2e-2), "mismatch vs reference"

    print("KERNEL_OK")
</pallas_src>

<mosaic_0001>
module attributes {stable_mosaic.version = 11 : i64} {
  func.func @_attn_dropout_kernel(%arg0: i32, %arg1: i32, %arg2: memref<1x8x32xf32, #tpu.memory_space<vmem>>, %arg3: memref<1x8x32xf32, #tpu.memory_space<vmem>>, %arg4: memref<1x8x8xi32, #tpu.memory_space<vmem>>, %arg5: memref<1x8x32xf32, #tpu.memory_space<vmem>>) attributes {dimension_semantics = [#tpu.dimension_semantics<parallel>, #tpu.dimension_semantics<parallel>], iteration_bounds = array<i64: 2, 1>, scalar_prefetch = 0 : i64, scratch_operands = 0 : i64, tpu.core_type = #tpu.core_type<tc>, window_params = [{transform_indices = @transform_0, window_bounds = array<i64: 1, 8, 32>}, {transform_indices = @transform_1, window_bounds = array<i64: 1, 8, 32>}, {transform_indices = @transform_2, window_bounds = array<i64: 1, 8, 8>}, {transform_indices = @transform_3, window_bounds = array<i64: 1, 8, 32>}]} {
    %c0 = arith.constant 0 : index
    %c0_0 = arith.constant 0 : index
    %c0_1 = arith.constant 0 : index
    %0 = vector.load %arg2[%c0, %c0_0, %c0_1] : memref<1x8x32xf32, #tpu.memory_space<vmem>>, vector<1x8x32xf32>
    %1 = vector.shape_cast %0 : vector<1x8x32xf32> to vector<8x32xf32>
    %c0_2 = arith.constant 0 : index
    %c0_3 = arith.constant 0 : index
    %c0_4 = arith.constant 0 : index
    %2 = vector.load %arg3[%c0_2, %c0_3, %c0_4] : memref<1x8x32xf32, #tpu.memory_space<vmem>>, vector<1x8x32xf32>
    %3 = vector.shape_cast %2 : vector<1x8x32xf32> to vector<8x32xf32>
    %cst = arith.constant dense<0.000000e+00> : vector<8x8xf32>
    %4 = tpu.matmul %1, %3, %cst {dimension_numbers = #tpu.dot_dimension_numbers<[1], [1], [0], [0], [0, 0, 1, 0], [], []>} : vector<8x32xf32>, vector<8x32xf32>, vector<8x8xf32> -> vector<8x8xf32>
    %cst_5 = arith.constant 1.153000e+00 : f32
    %5 = vector.broadcast %cst_5 : f32 to vector<8x8xf32>
    %6 = arith.mulf %4, %5 : vector<8x8xf32>
    %cst_6 = arith.constant dense<0xFF800000> : vector<8xf32>
    %7 = vector.multi_reduction <maximumf>, %6, %cst_6 [1] : vector<8x8xf32> to vector<8xf32>
    %8 = vector.shape_cast %7 : vector<8xf32> to vector<8x1xf32>
    %9 = vector.broadcast %8 : vector<8x1xf32> to vector<8x8xf32>
    %10 = arith.subf %6, %9 : vector<8x8xf32>
    %11 = math.exp %10 : vector<8x8xf32>
    %cst_7 = arith.constant dense<0.000000e+00> : vector<8xf32>
    %12 = vector.multi_reduction <add>, %11, %cst_7 [1] : vector<8x8xf32> to vector<8xf32>
    %13 = vector.shape_cast %12 : vector<8xf32> to vector<8x1xf32>
    %14 = tpu.reciprocal %13 {approx = true} : vector<8x1xf32> -> vector<8x1xf32>
    %cst_8 = arith.constant 1.42857146 : f32
    %15 = vector.broadcast %cst_8 : f32 to vector<8x1xf32>
    %16 = arith.mulf %14, %15 : vector<8x1xf32>
    %c0_9 = arith.constant 0 : index
    %c0_10 = arith.constant 0 : index
    %c0_11 = arith.constant 0 : index
    %17 = vector.load %arg4[%c0_9, %c0_10, %c0_11] : memref<1x8x8xi32, #tpu.memory_space<vmem>>, vector<1x8x8xi32>
    %18 = vector.shape_cast %17 : vector<1x8x8xi32> to vector<8x8xi32>
    %c1288490188_i32 = arith.constant 1288490188 : i32
    %19 = vector.broadcast %c1288490188_i32 : i32 to vector<8x8xi32>
    %20 = arith.cmpi uge, %18, %19 : vector<8x8xi32>
    %21 = vector.broadcast %16 : vector<8x1xf32> to vector<8x8xf32>
    %22 = arith.mulf %11, %21 : vector<8x8xf32>
    %cst_12 = arith.constant 0.000000e+00 : f32
    %23 = vector.broadcast %cst_12 : f32 to vector<8x8xf32>
    %24 = arith.select %20, %22, %23 : vector<8x8xi1>, vector<8x8xf32>
    %cst_13 = arith.constant dense<0.000000e+00> : vector<8x32xf32>
    %25 = tpu.matmul %24, %3, %cst_13 {dimension_numbers = #tpu.dot_dimension_numbers<[1], [0], [0], [1], [0, 0, 1, 1], [], []>} : vector<8x8xf32>, vector<8x32xf32>, vector<8x32xf32> -> vector<8x32xf32>
    %c0_14 = arith.constant 0 : index
    %c0_15 = arith.constant 0 : index
    %c0_16 = arith.constant 0 : index
    %26 = vector.load %arg5[%c0_14, %c0_15, %c0_16] : memref<1x8x32xf32, #tpu.memory_space<vmem>>, vector<1x8x32xf32>
    %27 = vector.shape_cast %26 : vector<1x8x32xf32> to vector<8x32xf32>
    %28 = vector.shape_cast %25 : vector<8x32xf32> to vector<1x8x32xf32>
    tpu.vector_store %arg5[%c0_14, %c0_15, %c0_16], %28 {strides = array<i32>} : memref<1x8x32xf32, #tpu.memory_space<vmem>>, vector<1x8x32xf32>,
    return
  }
  func.func @transform_0(%arg0: i32, %arg1: i32) -> (i32, i32, i32) {
    %c0_i32 = arith.constant 0 : i32
    %c0_i32_0 = arith.constant 0 : i32
    return %arg0, %arg1, %c0_i32 : i32, i32, i32
  }
  func.func @transform_1(%arg0: i32, %arg1: i32) -> (i32, i32, i32) {
    %c0_i32 = arith.constant 0 : i32
    %c0_i32_0 = arith.constant 0 : i32
    %c0_i32_1 = arith.constant 0 : i32
    return %arg0, %c0_i32, %c0_i32_0 : i32, i32, i32
  }
  func.func @transform_2(%arg0: i32, %arg1: i32) -> (i32, i32, i32) {
    %c0_i32 = arith.constant 0 : i32
    %c0_i32_0 = arith.constant 0 : i32
    return %arg0, %arg1, %c0_i32 : i32, i32, i32
  }
  func.func @transform_3(%arg0: i32, %arg1: i32) -> (i32, i32, i32) {
    %c0_i32 = arith.constant 0 : i32
    %c0_i32_0 = arith.constant 0 : i32
    return %arg0, %arg1, %c0_i32 : i32, i32, i32
  }
}

</mosaic_0001>

<bundles_post_ra>
// kernel: tpu_custom_call.1
= control target key start
LH: loop header
LB: loop body
LE: loop exit
PB: predicated region body
PF: predicated region fallthrough
CT: control target
= control target key end

     0   :  { %s1112_s0 = inlined_call_operand.hbm [shape: f32[2,8,32], index: 0, kind: input, shape index: {}]   ;;  %s1113_s1 = inlined_call_operand.hbm [shape: f32[2,8,32], index: 1, kind: input, shape index: {}]   ;;  %s1114_s2 = inlined_call_operand.hbm [shape: u32[2,8,8], index: 2, kind: input, shape index: {}]   ;;  %s1115_s3 = inlined_call_operand.hbm [shape: f32[2,8,32], index: 3, kind: output, shape index: {}]  }
   0x1   :  { %1119 = sst [smem:[#allocation14_spill]] %s1113_s1 }
   0x2   :  { %8 = vsyncpa [#allocation3], 0 }
   0x3   :  { %10 = vsyncpa [#allocation3 + $0x1], 0 }
   0x4   :  { %11 = vsyncpa [#allocation6], 0 }
   0x5   :  { %13 = vsyncpa [#allocation6 + $0x1], 0 }
   0x6   :  { %14 = vsyncpa [#allocation4], 0 }
   0x7   :  { %16 = vsyncpa [#allocation4 + $0x1], 0  ;;  %s896_s12 = smov 0   ;;  %s898_s13 = smov 0  }
   0x8   :  { %s900_s14 = smov 0   ;;  %s902_s15 = smov 0  }
   0x9   :  { %s904_s16 = smov 0   ;;  %s906_s17 = smov 0  }
   0xa LB: > { %1120 = sst [smem:[#allocation12_spill]] %s864_s16  ;;  %s927_s18 = sadd.s32 4294967295, %s868_s17   ;;  %s868_s17 = sphi %s906_s17, %s22_s17   ;;  %s864_s16 = sphi %s904_s16, %s1132_s16   ;;  %s860_s15 = sphi %s902_s15, %s1131_s15   ;;  %s856_s14 = sphi %s900_s14, %s1135_s14   ;;  %s852_s13 = sphi %s898_s13, %s1134_s13   ;;  %s848_s12 = sphi %s896_s12, %s1133_s12  }
   0xb   : > { %s587_s19 = sadd.s32 4294967294, %s868_s17   ;;  %s34_s20 = sadd.s32 1, %s864_s16 }
   0xc   : > { %s43_s21 = sadd.s32 1, %s856_s14  ;;  %p36_p0 = scmp.ge.s32.totalorder %s34_s20, 2 }
   0xd   : > { %p50_p1 = scmp.ne.s32.totalorder %s856_s14, %s852_s13  ;;  %p51_p2 = scmp.eq.s32.totalorder %s868_s17, 0 }
   0xe   : > { %p56_p3 = scmp.ne.s32.totalorder %s852_s13, %s848_s12  ;;  %s1137_s20 = smov (%p36_p0, %s34_s20), 0 }
   0xf   : > { %1121 = sst [smem:[#allocation13_spill]] %s1137_s20  ;;  %p939_p4 = por %p51_p2, %p50_p1 }
  0x10   : > { %p57_p5 = scmp.eq.s32.totalorder %s927_s18, 0  ;;  %s38_s23 = ssub.s32 %s864_s16, %s1137_s20 }
  0x11   : > { %p136_p6 = scmp.eq.s32.totalorder %s927_s18, 1  ;;  %p41_p7 = scmp.eq.s32.totalorder %s38_s23, 0 }
  0x12   : > { %p947_p8 = por %p57_p5, %p56_p3  ;;  %p142_p10 = scmp.eq.s32.totalorder %s587_s19, 1 }
  0x13   : > { %p951_p9 = por %p136_p6, %p50_p1  ;;  %p644_p13 = scmp.lt.s32.totalorder %s868_s17, 2 }
  0x14   : > { %s956_s26 = scalar_select %p41_p7, %s856_s14, %s43_s21  }
  0x15   : > { %p958_p11 = por %p142_p10, %p56_p3  ;;  %s1116_s28 = sand.u32 1, %s856_s14  }
  0x16   : > { %s967_s29 = sshll.u32 %s1116_s28, 3  ;;  %s970_s30 = sshll.u32 %s864_s16, 7 }
  0x17   : > { %p974_p0 = pnand %p644_p13, %p939_p4  ;;  %s181_s5 = sand.u32 1, %s868_s17  }
  0x18   : > { %s1127_s1 = sld [smem:[#allocation14_spill]]  ;;  %s185_s9 = scalar_lea.vmem [#allocation5], %s967_s29 }
  0x19   : > { %s192_s10 = sshll.u32 %s185_s9, 4  ;;  %p596_p1 = scmp.ge.s32.totalorder %s868_s17, 1  ;;  %s193_s10 = int_to_ptr.vmem [resolvable:$true] %s192_s10 }
  0x1a   : > { %p216_p2 = scmp.lt.s32.totalorder %s868_s17, 3  ;;  %s986_s11 = scalar_lea.sflag [#allocation6], %s181_s5 }
  0x1b   : > { %p702_p3 = pneg %p974_p0  ;;  %s713_s19 = scalar_lea.vmem %s193_s10, 128 }
  0x1c   : > { %p714_p4 = scmp.ne.s32.totalorder %s193_s10, %s713_s19  ;;  %s870_s21 = smov [#allocation5]  }
  0x1d   : > { %s718_s22 = sshll.u32 %s870_s21, 4  ;;  %s719_s22 = int_to_ptr.vmem [resolvable:$false] %s718_s22 }
  0x1e   : > { %s190_s8 = scalar_lea.hbm %s1127_s1, %s970_s30  ;;  %p716_p5 = pnand %p714_p4, %p702_p3 }
  0x1f   : > { %s720_s23 = scalar_lea.vmem %s719_s22, 256  ;;  %p721_p7 = scmp.lt.s32.totalorder %s193_s10, %s719_s22 }
  0x20   : > { %p717_p6 = pneg %p716_p5  ;;  %p722_p10 = scmp.lt.s32.totalorder %s720_s23, %s713_s19 }
  0x22   : > { %p723_p13 = por %p722_p10, %p721_p7 }
  0x24   : > { %p724_p12 = pnand %p723_p13, %p717_p6 }
  0x26   : > { %727 = shalt.err (!%p724_p12)
}
  0x27   : > { %636 = dma.hbm_to_vmem [thread:$0]  (!%p974_p0), %s190_s8, 128, %s193_s10, %s986_s11  }
  0x28   : > { %p1000_p4 = pnand %p596_p1, %p216_p2  ;;  %s172_s9 = scalar_lea.hbm %s1112_s0, %s970_s30 }
  0x29   : > { %s166_s19 = scalar_lea.vmem [#allocation2], %s967_s29  ;;  %s209_s28 = scalar_lea.hbm %s1114_s2, %s970_s30 }
  0x2a   : > { %s174_s21 = sshll.u32 %s166_s19, 4  ;;  %s1129_s1 = sand.u32 1, %s856_s14   ;;  %s175_s21 = int_to_ptr.vmem [resolvable:$true] %s174_s21 }
  0x2b   : > { %s163_s20 = scalar_lea.sflag [#allocation3], %s1129_s1  ;;  %s741_s8 = scalar_lea.vmem %s175_s21, 128 }
  0x2c   : > { %p742_p12 = scmp.ne.s32.totalorder %s175_s21, %s741_s8  ;;  %s871_s10 = smov [#allocation2]  }
  0x2d   : > { %s746_s16 = sshll.u32 %s871_s10, 4  ;;  %s747_s16 = int_to_ptr.vmem [resolvable:$false] %s746_s16 }
  0x2e   : > { %p744_p1 = pnand %p742_p12, %p702_p3  ;;  %s748_s6 = scalar_lea.vmem %s747_s16, 256 }
  0x2f   : > { %p749_p5 = scmp.lt.s32.totalorder %s175_s21, %s747_s16  ;;  %p750_p6 = scmp.lt.s32.totalorder %s748_s6, %s741_s8 }
  0x30   : > { %p745_p2 = pneg %p744_p1 }
  0x31   : > { %p751_p7 = por %p750_p6, %p749_p5 }
  0x33   : > { %p752_p10 = pnand %p751_p7, %p745_p2 }
  0x35   : > { %755 = shalt.err (!%p752_p10)
}
  0x36   : > { %633 = dma.hbm_to_vmem [thread:$0]  (!%p974_p0), %s172_s9, 128, %s175_s21, %s163_s20  }
  0x37   : > { %s203_s1 = scalar_lea.vmem [#allocation7], %s967_s29  ;;  %s872_s22 = smov [#allocation7]  }
  0x38   : > { %s211_s7 = sshll.u32 %s203_s1, 4  ;;  %s774_s16 = sshll.u32 %s872_s22, 4  ;;  %s212_s7 = int_to_ptr.vmem [resolvable:$true] %s211_s7  ;;  %s775_s16 = int_to_ptr.vmem [resolvable:$false] %s774_s16 }
  0x39   : > { %s769_s19 = scalar_lea.vmem %s212_s7, 128  ;;  %s776_s23 = scalar_lea.vmem %s775_s16, 256 }
  0x3a   : > { %p770_p13 = scmp.ne.s32.totalorder %s212_s7, %s769_s19  ;;  %p777_p2 = scmp.lt.s32.totalorder %s212_s7, %s775_s16 }
  0x3b   : > { %p778_p5 = scmp.lt.s32.totalorder %s776_s23, %s769_s19 }
  0x3c   : > { %p772_p12 = pnand %p770_p13, %p702_p3 }
  0x3d   : > { %p779_p6 = por %p778_p5, %p777_p2 }
  0x3e   : > { %p773_p1 = pneg %p772_p12 }
  0x40   : > { %p780_p7 = pnand %p779_p6, %p773_p1 }
  0x42   : > { %783 = shalt.err (!%p780_p7)
}
  0x43   : > { %639 = dma.hbm_to_vmem [thread:$0]  (!%p974_p0), %s209_s28, 128, %s212_s7, %s986_s11  }
  0x44   : > { %220 = sbr.rel (%p1000_p4) target bundleno = 800 (0x320), region = 32  ;;  %s1035_s9 = sand.u32 (!%p1000_p4), 1, %s852_s13  }
  0x45   : > { %s1038_s21 = sshll.u32 (!%p1000_p4), %s1035_s9, 3  ;;  %s223_s4 = scalar_lea.sflag (!%p1000_p4), [#allocation3], %s1035_s9 }
  0x46   : > { %s226_s8 = scalar_lea.vmem (!%p1000_p4), [#allocation2], %s1038_s21 }
  0x49   : > { %835 = dma.done.wait (%p947_p8), %s223_s4, 128  }
  0x4a   : > { %837 = vsyncadd (%p947_p8), %s223_s4, 4294967168  ;;  %s231_s28 = sand.u32 1, %s927_s18   ;;  %s235_s11 = scalar_lea.vmem [#allocation5], %s1038_s21 }
  0x4b   : > { %s232_s30 = scalar_lea.sflag [#allocation6], %s231_s28 }
  0x4c   : > { %839 = dma.done.wait (%p947_p8), %s232_s30, 256  }
  0x4d   : > { %841 = vsyncadd (%p947_p8), %s232_s30, 4294967040  ;;  %v873_v0 = vmov 0.0   ;;  %vm874_vm0 = vmmov 0   ;;  %vm279_vm1 = vcmask 261120   ;;  %v278_v1 = vld [vmem:[%s235_s11] sm:$0xff]  ;;  %v277_v2 = vld [vmem:[%s226_s8] sm:$0xff] }
  0x4e   : > { %612 = vmatprep.subr.mxu0 %v873_v0  ;;  %614 = vmatprep.mubr.msk.f32.mxu0 %vm874_vm0, %v873_v0  ;;  %vm357_vm2 = vcmask 64512   ;;  %s244_s18 = scalar_lea.vmem [#allocation7], %s1038_s21  ;;  %s605_s24 = sshll.u32 %s860_s15, 7 }
  0x4f   : > { %617 = vmatprep.subr.mxu1 %v873_v0  ;;  %619 = vmatprep.mubr.msk.f32.mxu1 %vm874_vm0, %v873_v0  ;;  %v369_v13 = vld [vmem:[%s244_s18] sm:$0xff]  ;;  %s276_s5 = scalar_lea.vmem [#allocation8], %s1038_s21  ;;  %s1063_s7 = scalar_lea.hbm %s1115_s3, %s605_s24 }
  0x50   : > { %613 = vmatpush3.xpose.msk.msra.mxu0 %vm279_vm1, %v278_v1  ;;  %618 = vmatpush3.msra.mxu1 %v278_v1  ;;  %vm370_vm3 = vcmp.ge.u32.totalorder %v369_v13, 1288490188  ;;  %s462_s10 = sshll.u32 %s276_s5, 4  ;;  %s448_s19 = scalar_lea.sflag [#allocation4], %s1035_s9  ;;  %s1065_s10 = int_to_ptr.vmem [resolvable:$true] %s462_s10 }
  0x51   : > { %s784_s22 = scalar_lea.vmem %s1065_s10, 128  ;;  %s875_s15 = smov [#allocation8]  }
  0x52   : > { %p785_p8 = scmp.ne.s32.totalorder %s1065_s10, %s784_s22  ;;  %s788_s16 = sshll.u32 %s875_s15, 4  ;;  %s789_s16 = int_to_ptr.vmem [resolvable:$false] %s788_s16 }
  0x53   : > { %615 = vmatmul.mubr.msk.f32.vlgmr.msra.gmra.mxu0 %vm279_vm1, %v277_v2  ;;  %s790_s23 = scalar_lea.vmem %s789_s16, 256  ;;  %p791_p4 = scmp.lt.s32.totalorder %s1065_s10, %s789_s16 }
  0x54   : > { %p786_p0 = pnand %p785_p8, %p951_p9  ;;  %p792_p10 = scmp.lt.s32.totalorder %s790_s23, %s784_s22 }
  0x56   : > { %p787_p3 = pneg %p786_p0  ;;  %p793_p13 = por %p792_p10, %p791_p4 }
  0x58   : > { %p794_p12 = pnand %p793_p13, %p787_p3 }
 0x113   : > { %v352_v3 = vpop.f32.mrf.mxu0 }
 0x114   : > { %v356_v4 = vmul.f32 1.153, %v352_v3 }
 0x115   : > { %v616_v5 = vpop.f32.mrf.mxu0 }
 0x116   : > { %v358_v6 = vsel %vm357_vm2, %v356_v4, -inf }
 0x117   : > { %359 = vmax.xlane.f32.xlu0 %v358_v6 }
 0x1a0   : > { %v360_v7 = vpop.xlane.xlu0 %359 }
 0x1a1   : > { %v361_v8 = vsub.f32 %v356_v4, %v360_v7 }
 0x1a3   : > { %v362_v9 = vmul.f32 1.442695, %v361_v8 }
 0x1a5   : > { %696 = vpow2.f32 %v362_v9 }
 0x1b2   : > { %v697_v10 = vpop.eup %696 }
 0x1b3   : > { %v364_v11 = vsel %vm357_vm2, %v697_v10, 0.0 }
 0x1b4   : > { %365 = vadd.xlane.f32.xlu0 %v364_v11 }
 0x23d   : > { %v366_v12 = vpop.xlane.xlu0 %365 }
 0x23e   : > { %698 = vrcp.f32 %v366_v12 }
 0x24b   : > { %v699_v14 = vpop.eup %698 }
 0x24c   : > { %v368_v15 = vmul.f32 1.4285715, %v699_v14 }
 0x24e   : > { %v371_v16 = vmul.f32 %v697_v10, %v368_v15 }
 0x250   : > { %v372_v17 = vsel %vm370_vm3, %v371_v16, 0.0 }
 0x251   : > { %620 = vmatmul.mubr.msk.f32.vlgmr.msra.gmra.mxu1 %vm357_vm2, %v372_v17 }
 0x311   : > { %v442_v18 = vpop.f32.mrf.mxu1 }
 0x312   : > { %446 = vst.msk [vmem:[%s276_s5] sm:$0xff] %vm279_vm1, %v442_v18 }
 0x313   : > { %v621_v19 = vpop.f32.mrf.mxu1 }
 0x314   : > { %797 = shalt.err (!%p794_p12)
}
 0x315   : > { %s798_s20 = scalar_lea.hbm %s1063_s7, 128  ;;  %s802_s21 = scalar_lea.hbm %s1115_s3, 256 }
 0x316   : > { %p799_p1 = scmp.ne.s32.totalorder %s1063_s7, %s798_s20  ;;  %p803_p6 = scmp.lt.s32.totalorder %s1063_s7, %s1115_s3 }
 0x317   : > { %p804_p7 = scmp.lt.s32.totalorder %s802_s21, %s798_s20 }
 0x318   : > { %p800_p2 = pnand %p799_p1, %p951_p9 }
 0x319   : > { %p805_p8 = por %p804_p7, %p803_p6 }
 0x31a   : > { %p801_p5 = pneg %p800_p2 }
 0x31c   : > { %p806_p0 = pnand %p805_p8, %p801_p5 }
 0x31e   : > { %809 = shalt.err (!%p806_p0)
}
 0x31f   : > { %628 = dma.vmem_to_hbm [thread:$0]  (%p951_p9), %s1065_s10, 128, %s1063_s7, %s448_s19  }
 0x320 PF: > { %s474_s28 = sand.u32 1, %s848_s12   ;;  %p1130_p3 = scmp.ge.s32.totalorder %s868_s17, 2 }
 0x321   : > { %s475_s30 = scalar_lea.sflag [#allocation4], %s474_s28 }
 0x322   : > { %p641_p4 = pnand %p1130_p3, %p958_p11 }
 0x324   : > { %p642_p10 = pneg %p641_p4 }
 0x326   : > { %843 = dma.done.wait (%p642_p10), %s475_s30, 128  }
 0x327   : > { %845 = vsyncadd (%p642_p10), %s475_s30, 4294967168  ;;  %s22_s17 = sadd.s32 1, %s868_s17   ;;  %s1131_s15 = sld [smem:[#allocation12_spill]] }
 0x328   : > { %p19_p13 = scmp.ge.s32.totalorder %s22_s17, 4   ;;  %s1132_s16 = sld [smem:[#allocation13_spill]] }
 0x329   : > { %s1133_s12 = smov %s852_s13  ;;  %s1134_s13 = smov %s856_s14 }
 0x32a   : > { %s1135_s14 = smov %s956_s26  ;;  %21 = sbr.rel (!%p19_p13) target bundleno = 10 (0xa), region = 101 }
 0x32f   :  { %480 = vsyncpa [#allocation3], 1 }
 0x330   :  { %482 = vsyncpa [#allocation3 + $0x1], 1 }
 0x331   :  { %483 = vsyncpa [#allocation6], 1 }
 0x332   :  { %485 = vsyncpa [#allocation6 + $0x1], 1 }
 0x333   :  { %486 = vsyncpa [#allocation4], 1 }
 0x334   :  { %488 = vsyncpa [#allocation4 + $0x1], 1 }

</bundles_post_ra>
